<compile_context>
chip_gen: v6e
topology: v6e:2x2x1
jax: 0.10.0
libtpu: 0.0.40
codegen_flags: <defaults>
</compile_context>

<pallas_src>
import functools

import jax
import jax.numpy as jnp
from jax.experimental import pallas as pl
from jax.experimental.pallas import tpu as pltpu


def _expand_kernel(x_ref, o_ref, *, gain, W):
    # x_ref: (1, s*s, rb, W)    rows r = (k, hh) of input sub-channel m = i*s + j
    # o_ref: (1, rb, s*s*W)     rows r = (k, hh), lanes q = i*(s*W) + ww*s + j
    s = gain
    W2 = W * s                 # output image width
    SW2 = s * W2               # lane extent of one output row group (= s*s*W)

    # Lane-scatter targets, built once per grid step (hoisted out of the m loop).
    ww_s = jax.lax.broadcasted_iota(jnp.int32, (W, SW2), 0) * s   # ww * s
    lane = jax.lax.broadcasted_iota(jnp.int32, (W, SW2), 1)       # output lane q

    acc = None
    for m in range(s * s):                      # static unroll, s*s terms
        i, j = divmod(m, s)
        # 0/1 expansion matrix: input column ww -> output lane i*W2 + ww*s + j.
        g = (lane == ww_s + (i * W2 + j)).astype(x_ref.dtype)
        part = jnp.dot(x_ref[0, m], g, preferred_element_type=jnp.float32)
        acc = part if acc is None else acc + part
    o_ref[0] = acc.astype(o_ref.dtype)


def _pick_row_block(n_rows, row_bytes, target_bytes=1 << 20):
    """Largest divisor of n_rows that is a multiple of 8 and fits target_bytes."""
    if n_rows % 8 != 0:
        return n_rows          # full extent is always a legal block dim
    best = 8
    d = 8
    while d <= n_rows:
        if n_rows % d == 0 and d * row_bytes <= target_bytes:
            best = d
        d += 8
    return best


def expand(x, gain=2):
    """Depth-to-space: (N, C, H, W) -> (N, C // gain**2, H*gain, W*gain)."""
    N, C, H, W = x.shape
    s = gain
    assert C % (s * s) == 0, "channels must be divisible by gain**2"
    C2 = C // (s * s)
    SW2 = s * s * W            # contiguous lane extent of one output row (k, hh)
    R = C2 * H                 # number of (k, hh) rows per sample

    itemsize = jnp.dtype(x.dtype).itemsize
    rb = _pick_row_block(R, SW2 * itemsize)
    n_rb = R // rb

    # Free (contiguous) views; no data movement happens outside the kernel.
    x_view = x.reshape(N, s * s, R, W)

    kernel = functools.partial(_expand_kernel, gain=s, W=W)

    # Only raise the scoped-VMEM limit if a degenerate shape forced a big block.
    block_bytes = rb * SW2 * itemsize
    vmem_need = 5 * block_bytes          # in + out, double-buffered, + headroom
    cp_kwargs = dict(dimension_semantics=("parallel", "parallel"))
    if vmem_need > 12 * (1 << 20):
        cp_kwargs["vmem_limit_bytes"] = int(min(vmem_need + (4 << 20), 56 << 20))

    out_flat = pl.pallas_call(
        kernel,
        out_shape=jax.ShapeDtypeStruct((N, R, SW2), x.dtype),
        grid_spec=pltpu.PrefetchScalarGridSpec(
            num_scalar_prefetch=0,
            grid=(N, n_rb),
            in_specs=[
                pl.BlockSpec((1, s * s, rb, W), lambda n, r: (n, 0, r, 0)),
            ],
            out_specs=pl.BlockSpec((1, rb, SW2), lambda n, r: (n, r, 0)),
        ),
        compiler_params=pltpu.CompilerParams(**cp_kwargs),
    )(x_view)

    return out_flat.reshape(N, C2, H * s, W * s)


if __name__ == "__main__":
    key = jax.random.PRNGKey(0)
    N, C, H, W = 2, 8, 16, 16
    gain = 2

    x = jax.random.normal(key, (N, C, H, W), dtype=jnp.float32)

    out = jax.block_until_ready(expand(x, gain=gain))

    # Pure-JAX reference mirroring the PyTorch view/permute/view.
    C2 = C // gain ** 2
    ref = x.reshape(N, gain, gain, C2, H, W)
    ref = jnp.transpose(ref, (0, 3, 4, 1, 5, 2))
    ref = ref.reshape(N, C2, H * gain, W * gain)

    assert out.shape == (N, C2, H * gain, W * gain)
    assert jnp.allclose(out, ref, atol=0.0), "mismatch vs reference"

    print("KERNEL_OK")
</pallas_src>

<mosaic_0001>
module attributes {stable_mosaic.version = 11 : i64} {
  func.func @_expand_kernel(%arg0: i32, %arg1: i32, %arg2: memref<1x4x32x16xf32, #tpu.memory_space<vmem>>, %arg3: memref<1x32x64xf32, #tpu.memory_space<vmem>>) attributes {dimension_semantics = [#tpu.dimension_semantics<parallel>, #tpu.dimension_semantics<parallel>], iteration_bounds = array<i64: 2, 1>, scalar_prefetch = 0 : i64, scratch_operands = 0 : i64, tpu.core_type = #tpu.core_type<tc>, window_params = [{transform_indices = @transform_0, window_bounds = array<i64: 1, 4, 32, 16>}, {transform_indices = @transform_1, window_bounds = array<i64: 1, 32, 64>}]} {
    %0 = tpu.iota {dimensions = array<i32: 0>} : vector<16x64xi32>
    %c2_i32 = arith.constant 2 : i32
    %1 = vector.broadcast %c2_i32 : i32 to vector<16x64xi32>
    %2 = arith.muli %0, %1 : vector<16x64xi32>
    %3 = tpu.iota {dimensions = array<i32: 1>} : vector<16x64xi32>
    %c0_i32 = arith.constant 0 : i32
    %4 = vector.broadcast %c0_i32 : i32 to vector<16x64xi32>
    %5 = arith.addi %2, %4 : vector<16x64xi32>
    %6 = arith.cmpi eq, %3, %5 : vector<16x64xi32>
    %7 = arith.extui %6 : vector<16x64xi1> to vector<16x64xi32>
    %8 = arith.sitofp %7 : vector<16x64xi32> to vector<16x64xf32>
    %c0 = arith.constant 0 : index
    %c0_0 = arith.constant 0 : index
    %c0_1 = arith.constant 0 : index
    %c0_2 = arith.constant 0 : index
    %9 = vector.load %arg2[%c0, %c0_0, %c0_1, %c0_2] : memref<1x4x32x16xf32, #tpu.memory_space<vmem>>, vector<1x1x32x16xf32>
    %10 = vector.shape_cast %9 : vector<1x1x32x16xf32> to vector<32x16xf32>
    %cst = arith.constant dense<0.000000e+00> : vector<32x64xf32>
    %11 = tpu.matmul %10, %8, %cst {dimension_numbers = #tpu.dot_dimension_numbers<[1], [0], [0], [1], [0, 0, 1, 1], [], []>} : vector<32x16xf32>, vector<16x64xf32>, vector<32x64xf32> -> vector<32x64xf32>
    %c1_i32 = arith.constant 1 : i32
    %12 = vector.broadcast %c1_i32 : i32 to vector<16x64xi32>
    %13 = arith.addi %2, %12 : vector<16x64xi32>
    %14 = arith.cmpi eq, %3, %13 : vector<16x64xi32>
    %15 = arith.extui %14 : vector<16x64xi1> to vector<16x64xi32>
    %16 = arith.sitofp %15 : vector<16x64xi32> to vector<16x64xf32>
    %c0_3 = arith.constant 0 : index
    %c1 = arith.constant 1 : index
    %c0_4 = arith.constant 0 : index
    %c0_5 = arith.constant 0 : index
    %17 = vector.load %arg2[%c0_3, %c1, %c0_4, %c0_5] : memref<1x4x32x16xf32, #tpu.memory_space<vmem>>, vector<1x1x32x16xf32>
    %18 = vector.shape_cast %17 : vector<1x1x32x16xf32> to vector<32x16xf32>
    %cst_6 = arith.constant dense<0.000000e+00> : vector<32x64xf32>
    %19 = tpu.matmul %18, %16, %cst_6 {dimension_numbers = #tpu.dot_dimension_numbers<[1], [0], [0], [1], [0, 0, 1, 1], [], []>} : vector<32x16xf32>, vector<16x64xf32>, vector<32x64xf32> -> vector<32x64xf32>
    %20 = arith.addf %11, %19 : vector<32x64xf32>
    %c32_i32 = arith.constant 32 : i32
    %21 = vector.broadcast %c32_i32 : i32 to vector<16x64xi32>
    %22 = arith.addi %2, %21 : vector<16x64xi32>
    %23 = arith.cmpi eq, %3, %22 : vector<16x64xi32>
    %24 = arith.extui %23 : vector<16x64xi1> to vector<16x64xi32>
    %25 = arith.sitofp %24 : vector<16x64xi32> to vector<16x64xf32>
    %c0_7 = arith.constant 0 : index
    %c2 = arith.constant 2 : index
    %c0_8 = arith.constant 0 : index
    %c0_9 = arith.constant 0 : index
    %26 = vector.load %arg2[%c0_7, %c2, %c0_8, %c0_9] : memref<1x4x32x16xf32, #tpu.memory_space<vmem>>, vector<1x1x32x16xf32>
    %27 = vector.shape_cast %26 : vector<1x1x32x16xf32> to vector<32x16xf32>
    %cst_10 = arith.constant dense<0.000000e+00> : vector<32x64xf32>
    %28 = tpu.matmul %27, %25, %cst_10 {dimension_numbers = #tpu.dot_dimension_numbers<[1], [0], [0], [1], [0, 0, 1, 1], [], []>} : vector<32x16xf32>, vector<16x64xf32>, vector<32x64xf32> -> vector<32x64xf32>
    %29 = arith.addf %20, %28 : vector<32x64xf32>
    %c33_i32 = arith.constant 33 : i32
    %30 = vector.broadcast %c33_i32 : i32 to vector<16x64xi32>
    %31 = arith.addi %2, %30 : vector<16x64xi32>
    %32 = arith.cmpi eq, %3, %31 : vector<16x64xi32>
    %33 = arith.extui %32 : vector<16x64xi1> to vector<16x64xi32>
    %34 = arith.sitofp %33 : vector<16x64xi32> to vector<16x64xf32>
    %c0_11 = arith.constant 0 : index
    %c3 = arith.constant 3 : index
    %c0_12 = arith.constant 0 : index
    %c0_13 = arith.constant 0 : index
    %35 = vector.load %arg2[%c0_11, %c3, %c0_12, %c0_13] : memref<1x4x32x16xf32, #tpu.memory_space<vmem>>, vector<1x1x32x16xf32>
    %36 = vector.shape_cast %35 : vector<1x1x32x16xf32> to vector<32x16xf32>
    %cst_14 = arith.constant dense<0.000000e+00> : vector<32x64xf32>
    %37 = tpu.matmul %36, %34, %cst_14 {dimension_numbers = #tpu.dot_dimension_numbers<[1], [0], [0], [1], [0, 0, 1, 1], [], []>} : vector<32x16xf32>, vector<16x64xf32>, vector<32x64xf32> -> vector<32x64xf32>
    %38 = arith.addf %29, %37 : vector<32x64xf32>
    %c0_15 = arith.constant 0 : index
    %c0_16 = arith.constant 0 : index
    %c0_17 = arith.constant 0 : index
    %39 = vector.load %arg3[%c0_15, %c0_16, %c0_17] : memref<1x32x64xf32, #tpu.memory_space<vmem>>, vector<1x32x64xf32>
    %40 = vector.shape_cast %39 : vector<1x32x64xf32> to vector<32x64xf32>
    %41 = vector.shape_cast %38 : vector<32x64xf32> to vector<1x32x64xf32>
    tpu.vector_store %arg3[%c0_15, %c0_16, %c0_17], %41 {strides = array<i32>} : memref<1x32x64xf32, #tpu.memory_space<vmem>>, vector<1x32x64xf32>,
    return
  }
  func.func @transform_0(%arg0: i32, %arg1: i32) -> (i32, i32, i32, i32) {
    %c0_i32 = arith.constant 0 : i32
    %c0_i32_0 = arith.constant 0 : i32
    %c0_i32_1 = arith.constant 0 : i32
    return %arg0, %c0_i32, %arg1, %c0_i32_0 : i32, i32, i32, i32
  }
  func.func @transform_1(%arg0: i32, %arg1: i32) -> (i32, i32, i32) {
    %c0_i32 = arith.constant 0 : i32
    %c0_i32_0 = arith.constant 0 : i32
    return %arg0, %arg1, %c0_i32 : i32, i32, i32
  }
}

</mosaic_0001>

<bundles_post_ra>
// kernel: tpu_custom_call.1
= control target key start
LH: loop header
LB: loop body
LE: loop exit
PB: predicated region body
PF: predicated region fallthrough
CT: control target
= control target key end

     0   :  { %6 = vsyncpa [#allocation3], 0  ;;  %s1130_s0 = inlined_call_operand.vmem [shape: f32[2,4,32,16], index: 0, kind: input, shape index: {}]   ;;  %s1131_s1 = inlined_call_operand.hbm [shape: f32[2,32,64], index: 1, kind: output, shape index: {}]  }
   0x1   :  { %8 = vsyncpa [#allocation3 + $0x1], 0  ;;  %s972_s6 = smov 0   ;;  %s974_s7 = smov 0  }
   0x2   :  { %s976_s8 = smov 0   ;;  %s978_s9 = smov 0  }
   0x3   :  { %s980_s10 = smov 0   ;;  %s982_s11 = smov 0  }
   0x4 LB: > { %s699_s12 = sadd.s32 4294967295, %s956_s11   ;;  %s700_s13 = sadd.s32 4294967294, %s956_s11   ;;  %s956_s11 = sphi %s982_s11, %s14_s11   ;;  %s952_s10 = sphi %s980_s10, %s1138_s10   ;;  %s948_s9 = sphi %s978_s9, %s1137_s9   ;;  %s944_s8 = sphi %s976_s8, %s1136_s8   ;;  %s940_s7 = sphi %s974_s7, %s1135_s7   ;;  %s936_s6 = sphi %s972_s6, %s1134_s6  }
   0x5   : > { %s26_s14 = sadd.s32 1, %s952_s10  ;;  %s63_s15 = sadd.s32 1, %s944_s8 }
   0x6   : > { %p28_p0 = scmp.ge.s32.totalorder %s26_s14, 2  ;;  %p73_p1 = scmp.ne.s32.totalorder %s944_s8, %s940_s7 }
   0x7   : > { %p74_p2 = scmp.eq.s32.totalorder %s699_s12, 1  ;;  %p79_p3 = scmp.ne.s32.totalorder %s940_s7, %s936_s6 }
   0x8   : > { %s1140_s14 = smov (%p28_p0, %s26_s14), 0  ;;  %p80_p5 = scmp.eq.s32.totalorder %s700_s13, 1 }
   0x9   : > { %p1012_p4 = por %p74_p2, %p73_p1  ;;  %s58_s17 = ssub.s32 %s952_s10, %s1140_s14 }
   0xa   : > { %p703_p6 = scmp.ge.s32.totalorder %s956_s11, 1  ;;  %p61_p7 = scmp.eq.s32.totalorder %s58_s17, 0 }
   0xb   : > { %p1019_p8 = por %p80_p5, %p79_p3  ;;  %p111_p9 = scmp.lt.s32.totalorder %s956_s11, 3 }
   0xc   : > { %s1025_s19 = scalar_select %p61_p7, %s944_s8, %s63_s15  }
   0xd   : > { %p112_p10 = pnand %p703_p6, %p111_p9 }
   0xe   : > { %p136_p11 = scmp.lt.s32.totalorder (!%p112_p10), %s948_s9, 1  ;;  %s132_s25 = sand.u32 (!%p112_p10), 1, %s940_s7  }
   0xf   : > { %115 = sbr.rel (%p112_p10) target bundleno = 260 (0x104), region = 24  ;;  %s704_s26 = sshll.u32 (!%p112_p10), %s132_s25, 5 }
  0x10   : > { %s134_s27 = scalar_lea.vmem (!%p112_p10), [#allocation2], %s704_s26  ;;  %s757_s29 = sshll.u32 (!%p112_p10), %s948_s9, 9 }
  0x11   : > { %s620_s28 = sshll.u32 (!%p112_p10), %s134_s27, 4  ;;  %s1079_s3 = scalar_lea.hbm (!%p112_p10), %s1131_s1, %s757_s29  ;;  %s1074_s28 = int_to_ptr.vmem [resolvable:$true] %s620_s28 }
  0x12   : > { %s1085_s4 = scalar_lea.sflag (!%p112_p10), [#allocation3], %s132_s25  ;;  %s880_s5 = scalar_lea.vmem (!%p112_p10), %s1074_s28, 512 }
  0x13   : > { %p881_p12 = scmp.ne.s32.totalorder (!%p112_p10), %s1074_s28, %s880_s5 }
  0x14   : > { %v146_v0 = vlaneseq  ;;  %s137_s20 = scalar_select %p136_p11, %s948_s9, 1  ;;  %vm176_vm0 = vcmask 130048   ;;  %v958_v11 = vmov 1.0   ;;  %vm599_vm9 = vcmask 523264  }
  0x15   : > { %p882_p13 = pnand %p881_p12, %p1012_p4  ;;  %s959_s9 = smov [#allocation2]  }
  0x16   : > { %v147_v1 = vshrl.u32 %v146_v0, 7  ;;  %v152_v3 = vand.u32 127, %v146_v0  ;;  %s756_s21 = sshll.u32 %s137_s20, 7  ;;  %s884_s12 = sshll.u32 %s959_s9, 4  ;;  %s885_s12 = int_to_ptr.vmem [resolvable:$false] %s884_s12 }
  0x17   : > { %s1032_s24 = scalar_lea.vmem %s1130_s0, %s756_s21  ;;  %p883_p0 = pneg %p882_p13 }
  0x18   : > { %v148_v2 = vadd.s32 8, %v147_v1  ;;  %v149_v4 = vmul.u32 2, %v147_v1  ;;  %v711_v7 = vld [vmem:[%s1032_s24 + $0x20] sm:$0xff]  ;;  %v160_v13 = vld [vmem:[%s1032_s24 + $0x8] sm:$0xff]  ;;  %v713_v17 = vld [vmem:[%s1032_s24 + $0x30] sm:$0xff]  ;;  %s886_s13 = scalar_lea.vmem %s885_s12, 1024  ;;  %p887_p1 = scmp.lt.s32.totalorder %s1074_s28, %s885_s12 }
  0x19   : > { %v159_v8 = vld [vmem:[%s1032_s24] sm:$0xff]  ;;  %786 = vmatprep.mubr.msk.f32.mxu0 %vm176_vm0, %v711_v7  ;;  %v712_v15 = vld [vmem:[%s1032_s24 + $0x28] sm:$0xff]  ;;  %v161_v18 = vld [vmem:[%s1032_s24 + $0x10] sm:$0xff]  ;;  %p888_p2 = scmp.lt.s32.totalorder %s886_s13, %s880_s5 }
  0x1a   : > { %v150_v5 = vmul.u32 2, %v148_v2  ;;  %v163_v6 = vadd.s32 1, %v149_v4  ;;  %796 = vmatprep.mubr.msk.f32.mxu1 %vm176_vm0, %v159_v8  ;;  %vm153_vm2 = vcmp.eq.s32.totalorder %v152_v3, %v149_v4  ;;  %v371_v14 = vadd.s32 32, %v149_v4  ;;  %v162_v19 = vld [vmem:[%s1032_s24 + $0x18] sm:$0xff]  ;;  %v729_v21 = vld [vmem:[%s1032_s24 + $0x40] sm:$0xff]  ;;  %v742_v23 = vld [vmem:[%s1032_s24 + $0x68] sm:$0xff] }
  0x1b   : > { %v485_v16 = vadd.s32 33, %v149_v4  ;;  %v714_v20 = vld [vmem:[%s1032_s24 + $0x38] sm:$0xff]  ;;  %v741_v22 = vld [vmem:[%s1032_s24 + $0x60] sm:$0xff]  ;;  %v730_v24 = vld [vmem:[%s1032_s24 + $0x48] sm:$0xff]  ;;  %p889_p3 = por %p888_p2, %p887_p1 }
  0x1c   : > { %v164_v9 = vadd.s32 1, %v150_v5  ;;  %vm154_vm1 = vcmp.eq.s32.totalorder %v152_v3, %v150_v5  ;;  %v372_v10 = vadd.s32 32, %v150_v5  ;;  %v486_v12 = vadd.s32 33, %v150_v5  ;;  %v743_v25 = vld [vmem:[%s1032_s24 + $0x70] sm:$0xff]  ;;  %v744_v27 = vld [vmem:[%s1032_s24 + $0x78] sm:$0xff] }
  0x1d   : > { %792 = vmatprep.subr.msk.mxu1 %vm154_vm1, %v958_v11  ;;  %vm165_vm4 = vcmp.eq.s32.totalorder %v152_v3, %v163_v6  ;;  %vm373_vm7 = vcmp.eq.s32.totalorder %v152_v3, %v371_v14  ;;  %vm487_vm8 = vcmp.eq.s32.totalorder %v152_v3, %v485_v16  ;;  %v731_v26 = vld [vmem:[%s1032_s24 + $0x50] sm:$0xff]  ;;  %v732_v28 = vld [vmem:[%s1032_s24 + $0x58] sm:$0xff]  ;;  %p890_p5 = pnand %p889_p3, %p883_p0 }
  0x1e   : > { %vm166_vm3 = vcmp.eq.s32.totalorder %v152_v3, %v164_v9  ;;  %793 = vmatpush3.msk.msra.mxu1 %vm154_vm1, %v958_v11  ;;  %vm488_vm5 = vcmp.eq.s32.totalorder %v152_v3, %v486_v12  ;;  %vm374_vm6 = vcmp.eq.s32.totalorder %v152_v3, %v372_v10 }
  0x1f   : > { %782 = vmatprep.subr.msk.mxu0 %vm166_vm3, %v958_v11  ;;  %794 = vmatprep.subr.msk.mxu1 %vm153_vm2, %v958_v11 }
  0x20   : > { %783 = vmatpush3.msk.msra.mxu0 %vm166_vm3, %v958_v11  ;;  %795 = vmatpush3.msk.msra.mxu1 %vm153_vm2, %v958_v11 }
  0x21   : > { %784 = vmatprep.subr.msk.mxu0 %vm165_vm4, %v958_v11  ;;  %797 = vmatmul.mubr.msk.f32.vlgmr.msra.gmra.mxu1 %vm176_vm0, %v160_v13 }
  0x22   : > { %785 = vmatpush3.msk.msra.mxu0 %vm165_vm4, %v958_v11  ;;  %812 = vmatprep.subr.msk.mxu1 %vm488_vm5, %v958_v11 }
  0x23   : > { %787 = vmatmul.mubr.msk.f32.vlgmr.msra.gmra.mxu0 %vm176_vm0, %v712_v15  ;;  %802 = vmatprep.subr.msk.mxu0 %vm374_vm6, %v958_v11 }
  0x24   : > { %803 = vmatpush3.msk.msra.mxu0 %vm374_vm6, %v958_v11  ;;  %789 = vmatprep.mubr.msk.f32.mxu0 %vm176_vm0, %v713_v17 }
  0x25   : > { %799 = vmatprep.mubr.msk.f32.mxu1 %vm176_vm0, %v161_v18  ;;  %813 = vmatpush3.msk.msra.mxu1 %vm488_vm5, %v958_v11 }
  0x26   : > { %800 = vmatmul.mubr.msk.f32.gmra.mxu1 %vm176_vm0, %v162_v19  ;;  %804 = vmatprep.subr.msk.mxu0 %vm373_vm7, %v958_v11 }
  0x27   : > { %790 = vmatmul.mubr.msk.f32.gmra.mxu0 %vm176_vm0, %v714_v20  ;;  %814 = vmatprep.subr.msk.mxu1 %vm487_vm8, %v958_v11 }
  0x28   : > { %805 = vmatpush3.msk.msra.mxu0 %vm373_vm7, %v958_v11  ;;  %806 = vmatprep.mubr.msk.f32.mxu0 %vm176_vm0, %v729_v21 }
  0x29   : > { %815 = vmatpush3.msk.msra.mxu1 %vm487_vm8, %v958_v11  ;;  %816 = vmatprep.mubr.msk.f32.mxu1 %vm176_vm0, %v741_v22 }
  0x2a   : > { %817 = vmatmul.mubr.msk.f32.vlgmr.msra.gmra.mxu1 %vm176_vm0, %v742_v23 }
  0x2b   : > { %807 = vmatmul.mubr.msk.f32.vlgmr.msra.gmra.mxu0 %vm176_vm0, %v730_v24  ;;  %819 = vmatprep.mubr.msk.f32.mxu1 %vm176_vm0, %v743_v25 }
  0x2c   : > { %809 = vmatprep.mubr.msk.f32.mxu0 %vm176_vm0, %v731_v26 }
  0x2e   : > { %820 = vmatmul.mubr.msk.f32.gmra.mxu1 %vm176_vm0, %v744_v27 }
  0x2f   : > { %810 = vmatmul.mubr.msk.f32.gmra.mxu0 %vm176_vm0, %v732_v28 }
  0xe1   : > { %v798_v29 = vpop.f32.mrf.mxu1 }
  0xe3   : > { %v788_v30 = vpop.f32.mrf.mxu0  ;;  %v352_v31 = vpop.f32.mrf.mxu1 }
  0xe4   : > { %v358_v37 = vadd.f32 %v798_v29, %v788_v30 }
  0xe5   : > { %v255_v32 = vpop.f32.mrf.mxu0 }
  0xe6   : > { %v801_v33 = vpop.f32.mrf.mxu1  ;;  %v353_v40 = vadd.f32 %v352_v31, %v255_v32 }
  0xe7   : > { %v791_v34 = vpop.f32.mrf.mxu0 }
  0xe8   : > { %v362_v35 = vpop.f32.mrf.mxu1  ;;  %v368_v44 = vadd.f32 %v801_v33, %v791_v34 }
  0xe9   : > { %v265_v36 = vpop.f32.mrf.mxu0 }
  0xea   : > { %v818_v38 = vpop.f32.mrf.mxu1  ;;  %v363_v49 = vadd.f32 %v362_v35, %v265_v36 }
  0xeb   : > { %v808_v39 = vpop.f32.mrf.mxu0 }
  0xec   : > { %v482_v41 = vadd.f32 %v808_v39, %v358_v37  ;;  %v576_v42 = vpop.f32.mrf.mxu1 }
  0xed   : > { %v462_v43 = vpop.f32.mrf.mxu0 }
  0xee   : > { %v596_v45 = vadd.f32 %v818_v38, %v482_v41  ;;  %v481_v46 = vadd.f32 %v462_v43, %v353_v40  ;;  %v821_v48 = vpop.f32.mrf.mxu1 }
  0xef   : > { %v811_v47 = vpop.f32.mrf.mxu0 }
  0xf0   : > { %601 = vst.msk [vmem:[%s134_s27 + $0x8] sm:$0xff] %vm599_vm9, %v596_v45  ;;  %v595_v50 = vadd.f32 %v576_v42, %v481_v46  ;;  %v484_v51 = vadd.f32 %v811_v47, %v368_v44  ;;  %v586_v55 = vpop.f32.mrf.mxu1 }
  0xf1   : > { %v472_v52 = vpop.f32.mrf.mxu0 }
  0xf2   : > { %600 = vst.msk [vmem:[%s134_s27] sm:$0xff] %vm599_vm9, %v595_v50  ;;  %v598_v53 = vadd.f32 %v821_v48, %v484_v51  ;;  %v483_v54 = vadd.f32 %v472_v52, %v363_v49 }
  0xf4   : > { %603 = vst.msk [vmem:[%s134_s27 + $0x18] sm:$0xff] %vm599_vm9, %v598_v53  ;;  %v597_v56 = vadd.f32 %v586_v55, %v483_v54 }
  0xf6   : > { %602 = vst.msk [vmem:[%s134_s27 + $0x10] sm:$0xff] %vm599_vm9, %v597_v56 }
  0xf7   : > { %893 = shalt.err (!%p890_p5)
}
  0xf8   : > { %s894_s15 = scalar_lea.hbm %s1079_s3, 512  ;;  %s898_s21 = scalar_lea.hbm %s1131_s1, 1024 }
  0xf9   : > { %p895_p6 = scmp.ne.s32.totalorder %s1079_s3, %s894_s15  ;;  %p899_p10 = scmp.lt.s32.totalorder %s1079_s3, %s1131_s1 }
  0xfa   : > { %p900_p11 = scmp.lt.s32.totalorder %s898_s21, %s894_s15 }
  0xfb   : > { %p896_p7 = pnand %p895_p6, %p1012_p4 }
  0xfc   : > { %p901_p12 = por %p900_p11, %p899_p10 }
  0xfd   : > { %p897_p9 = pneg %p896_p7 }
  0xff   : > { %p902_p13 = pnand %p901_p12, %p897_p9 }
 0x101   : > { %905 = shalt.err (!%p902_p13)
}
 0x102   : > { %s960_s24 = smov 128   ;;  %s961_s25 = smov 8  }
 0x103   : > { %822 = dma.vmem_to_hbm [thread:$0]  (%p1012_p4), %s1074_s28, 512, %s1079_s3, %s1085_s4, %s960_s24, %s960_s24, %s961_s25  }
 0x104 PF: > { %p828_p0 = scmp.ge.s32.totalorder %s956_s11, 2  ;;  %s635_s26 = sand.u32 1, %s936_s6  }
 0x105   : > { %s636_s27 = scalar_lea.sflag [#allocation3], %s635_s26 }
 0x106   : > { %p825_p1 = pnand %p828_p0, %p1019_p8 }
 0x108   : > { %p826_p2 = pneg %p825_p1 }
 0x10a   : > { %931 = dma.done.wait (%p826_p2), %s636_s27, 512  }
 0x10b   : > { %933 = vsyncadd (%p826_p2), %s636_s27, 4294966784  ;;  %s14_s11 = sadd.s32 1, %s956_s11   ;;  %s1134_s6 = smov %s940_s7 }
 0x10c   : > { %p11_p3 = scmp.ge.s32.totalorder %s14_s11, 4   ;;  %s1135_s7 = smov %s944_s8 }
 0x10d   : > { %s1136_s8 = smov %s1025_s19  ;;  %s1137_s9 = smov %s952_s10 }
 0x10e   : > { %s1138_s10 = smov %s1140_s14  ;;  %13 = sbr.rel (!%p11_p3) target bundleno = 4 (0x4), region = 62 }
 0x113   :  { %641 = vsyncpa [#allocation3], 1 }
 0x114   :  { %643 = vsyncpa [#allocation3 + $0x1], 1 }

</bundles_post_ra>
